<compile_context>
chip_gen: v6e
topology: v6e:2x2x1
jax: 0.10.0
libtpu: 0.0.40
codegen_flags: <defaults>
</compile_context>

<pallas_src>
import jax
import jax.numpy as jnp
from jax.experimental import pallas as pl
from jax.experimental.pallas import tpu as pltpu

IN_DIM, H1, H2, OUT_DIM = 20, 64, 32, 16

SLAB = 8                       # batch rows folded per lane-dense slab row
S_IN = SLAB * IN_DIM           # 160
S_H1 = SLAB * H1               # 512
S_H2 = SLAB * H2               # 256
S_OUT = SLAB * OUT_DIM         # 128
ROW_QUANT = 8 * SLAB           # 64: batch-tile quantum (8 sublanes of slab rows)

MAX_TILE_B = 8192              # batch rows per grid step (multiple of ROW_QUANT)


def nest_mlp_kernel(x_ref, w1_ref, w2_ref, w3_ref, b1_ref, b2_ref, b3_ref, o_ref):
    """Fused (Linear->ReLU)->(Linear->ReLU)->Linear on one batch tile.

    x_ref : (tB/8, 160) f32   -- 8 batch rows per slab row (lane dense)
    w*_ref: bf16 8x block-diagonal weights, exact shapes
            (160,512) / (512,256) / (256,128)
    b*_ref: f32 8x-tiled bias rows (1,512) / (1,256) / (1,128)
    o_ref : (tB/8, 128) f32   -- 8 output rows (16 each) per slab row
    """
    x = x_ref[...].astype(jnp.bfloat16)

    # Layer 1: Linear(20 -> 64) + ReLU   (bf16 MXU, f32 accumulate)
    h = jnp.dot(x, w1_ref[...], preferred_element_type=jnp.float32) + b1_ref[...]
    h = jnp.maximum(h, 0.0).astype(jnp.bfloat16)

    # Layer 2: Linear(64 -> 32) + ReLU
    h = jnp.dot(h, w2_ref[...], preferred_element_type=jnp.float32) + b2_ref[...]
    h = jnp.maximum(h, 0.0).astype(jnp.bfloat16)

    # Layer 3: Linear(32 -> 16), no activation
    out = jnp.dot(h, w3_ref[...], preferred_element_type=jnp.float32) + b3_ref[...]
    o_ref[...] = out.astype(o_ref.dtype)


def _block_diag_repeat(w, reps):
    """Block-diagonal matrix with `reps` copies of w along the diagonal."""
    k, n = w.shape
    out = jnp.zeros((reps * k, reps * n), w.dtype)
    for r in range(reps):
        out = out.at[r * k:(r + 1) * k, r * n:(r + 1) * n].set(w)
    return out


def pack_params(params):
    """Pack the 6 parameter tensors into 6 exact-shaped kernel inputs (one-time)."""
    w1, b1, w2, b2, w3, b3 = params
    w1s = _block_diag_repeat(w1, SLAB).astype(jnp.bfloat16)   # (160, 512)
    w2s = _block_diag_repeat(w2, SLAB).astype(jnp.bfloat16)   # (512, 256)
    w3s = _block_diag_repeat(w3, SLAB).astype(jnp.bfloat16)   # (256, 128)
    b1s = jnp.tile(b1, SLAB).reshape(1, S_H1).astype(jnp.float32)   # (1, 512)
    b2s = jnp.tile(b2, SLAB).reshape(1, S_H2).astype(jnp.float32)   # (1, 256)
    b3s = jnp.tile(b3, SLAB).reshape(1, S_OUT).astype(jnp.float32)  # (1, 128)
    return w1s, w2s, w3s, b1s, b2s, b3s


def _round_up(x, m):
    return (x + m - 1) // m * m


def _ceil_div(a, b):
    return -(-a // b)


@jax.jit
def nest_mlp_forward(x, w1s, w2s, w3s, b1s, b2s, b3s):
    """Batch-tiled fused MLP forward.  x: (B, 20) f32 -> (B, 16) f32."""
    B = x.shape[0]
    b_min = _round_up(B, ROW_QUANT)                       # minimal padded batch
    # Even split into >= 2 parallel steps once there is >= 128 rows of work
    # (v7x megacore sharding); at least ceil(b_min / MAX_TILE_B) steps so each
    # step's tile stays within MAX_TILE_B rows.
    n_steps = max(_ceil_div(b_min, MAX_TILE_B), 2 if b_min >= 2 * ROW_QUANT else 1)
    tile_b = _round_up(_ceil_div(b_min, n_steps), ROW_QUANT)
    b_pad = n_steps * tile_b

    # Pad batch, then fold 8 rows per slab row.  Row-major (B,20)->(B/8,160) is
    # a contiguity-preserving reshape (pure metadata, no data movement).
    x_pad = jnp.pad(x, ((0, b_pad - B), (0, 0)))
    x_slab = x_pad.reshape(b_pad // SLAB, S_IN)

    inv = lambda i: (0, 0)   # grid-invariant resident blocks (weights / biases)

    out_slab = pl.pallas_call(
        nest_mlp_kernel,
        out_shape=jax.ShapeDtypeStruct((b_pad // SLAB, S_OUT), jnp.float32),
        grid_spec=pltpu.PrefetchScalarGridSpec(
            num_scalar_prefetch=0,
            grid=(n_steps,),
            in_specs=[
                pl.BlockSpec((tile_b // SLAB, S_IN), lambda i: (i, 0)),
                pl.BlockSpec((S_IN, S_H1), inv),
                pl.BlockSpec((S_H1, S_H2), inv),
                pl.BlockSpec((S_H2, S_OUT), inv),
                pl.BlockSpec((1, S_H1), inv),
                pl.BlockSpec((1, S_H2), inv),
                pl.BlockSpec((1, S_OUT), inv),
            ],
            out_specs=pl.BlockSpec((tile_b // SLAB, S_OUT), lambda i: (i, 0)),
        ),
        compiler_params=pltpu.CompilerParams(
            dimension_semantics=("parallel",),        # shard batch across TCs on v7x
            vmem_limit_bytes=32 * 1024 * 1024,        # large tiles safe on v5e too
        ),
    )(x_slab, w1s, w2s, w3s, b1s, b2s, b3s)

    # Unfold slab rows back to (B, 16); again a free row-major reshape.
    return out_slab.reshape(b_pad, OUT_DIM)[:B]


def init_params(key):
    """Deterministic init mirroring torch.nn.Linear defaults (Lazy layer shapes)."""
    k1, k2, k3, k4, k5, k6 = jax.random.split(key, 6)

    def lin(kw, kb, fan_in, fan_out):
        bound = 1.0 / jnp.sqrt(fan_in)
        w = jax.random.uniform(kw, (fan_in, fan_out), jnp.float32, -bound, bound)
        b = jax.random.uniform(kb, (fan_out,), jnp.float32, -bound, bound)
        return w, b

    w1, b1 = lin(k1, k2, IN_DIM, H1)
    w2, b2 = lin(k3, k4, H1, H2)
    w3, b3 = lin(k5, k6, H2, OUT_DIM)
    return (w1, b1, w2, b2, w3, b3)


def reference_forward(x, params):
    """Pure-JAX f32 reference for correctness checking."""
    w1, b1, w2, b2, w3, b3 = params
    h = jnp.maximum(x @ w1 + b1[None, :], 0.0)
    h = jnp.maximum(h @ w2 + b2[None, :], 0.0)
    return h @ w3 + b3[None, :]


if __name__ == "__main__":
    key = jax.random.PRNGKey(0)
    kx, kx2, kp = jax.random.split(key, 3)

    params = init_params(kp)
    packed = pack_params(params)

    # torch.rand(2, 20) analogue: uniform [0, 1), batch=2, features=20.
    x = jax.random.uniform(kx, (2, IN_DIM), jnp.float32)
    out = nest_mlp_forward(x, *packed)
    out = jax.block_until_ready(out)
    ref = reference_forward(x, params)
    assert out.shape == (2, OUT_DIM), out.shape
    # bf16 matmul operands with f32 accumulation -> loosened tolerance vs f32 ref.
    assert jnp.allclose(out, ref, atol=2e-2, rtol=2e-2), (
        "mismatch vs reference", jnp.max(jnp.abs(out - ref)))

    # Secondary check exercising the multi-step (>= 2 parallel grid steps) path
    # with non-tile-multiple batch (tests padding + even-split tiling).
    x2 = jax.random.uniform(kx2, (200, IN_DIM), jnp.float32)
    out2 = jax.block_until_ready(nest_mlp_forward(x2, *packed))
    ref2 = reference_forward(x2, params)
    assert out2.shape == (200, OUT_DIM), out2.shape
    assert jnp.allclose(out2, ref2, atol=2e-2, rtol=2e-2), (
        "mismatch vs reference (B=200)", jnp.max(jnp.abs(out2 - ref2)))

    print("KERNEL_OK")
</pallas_src>

<mosaic_0001>
module attributes {stable_mosaic.version = 11 : i64} {
  func.func @nest_mlp_kernel(%arg0: i32, %arg1: memref<8x160xf32, #tpu.memory_space<vmem>>, %arg2: memref<160x512xbf16, #tpu.memory_space<vmem>>, %arg3: memref<512x256xbf16, #tpu.memory_space<vmem>>, %arg4: memref<256x128xbf16, #tpu.memory_space<vmem>>, %arg5: memref<1x512xf32, #tpu.memory_space<vmem>>, %arg6: memref<1x256xf32, #tpu.memory_space<vmem>>, %arg7: memref<1x128xf32, #tpu.memory_space<vmem>>, %arg8: memref<8x128xf32, #tpu.memory_space<vmem>>) attributes {dimension_semantics = [#tpu.dimension_semantics<parallel>], iteration_bounds = array<i64: 1>, scalar_prefetch = 0 : i64, scratch_operands = 0 : i64, tpu.core_type = #tpu.core_type<tc>, window_params = [{transform_indices = @transform_0, window_bounds = array<i64: 8, 160>}, {pipeline_mode = #tpu.pipeline_mode<synchronous>, transform_indices = @transform_1, window_bounds = array<i64: 160, 512>}, {pipeline_mode = #tpu.pipeline_mode<synchronous>, transform_indices = @transform_2, window_bounds = array<i64: 512, 256>}, {pipeline_mode = #tpu.pipeline_mode<synchronous>, transform_indices = @transform_3, window_bounds = array<i64: 256, 128>}, {pipeline_mode = #tpu.pipeline_mode<synchronous>, transform_indices = @transform_4, window_bounds = array<i64: 1, 512>}, {pipeline_mode = #tpu.pipeline_mode<synchronous>, transform_indices = @transform_5, window_bounds = array<i64: 1, 256>}, {pipeline_mode = #tpu.pipeline_mode<synchronous>, transform_indices = @transform_6, window_bounds = array<i64: 1, 128>}, {transform_indices = @transform_7, window_bounds = array<i64: 8, 128>}]} {
    %c0 = arith.constant 0 : index
    %c0_0 = arith.constant 0 : index
    %0 = vector.load %arg1[%c0, %c0_0] : memref<8x160xf32, #tpu.memory_space<vmem>>, vector<8x160xf32>
    %1 = arith.truncf %0 : vector<8x160xf32> to vector<8x160xbf16>
    %c0_1 = arith.constant 0 : index
    %c0_2 = arith.constant 0 : index
    %2 = vector.load %arg2[%c0_1, %c0_2] : memref<160x512xbf16, #tpu.memory_space<vmem>>, vector<160x512xbf16>
    %cst = arith.constant dense<0.000000e+00> : vector<8x512xf32>
    %3 = tpu.matmul %1, %2, %cst {dimension_numbers = #tpu.dot_dimension_numbers<[1], [0], [0], [1], [0, 0, 1, 1], [], []>} : vector<8x160xbf16>, vector<160x512xbf16>, vector<8x512xf32> -> vector<8x512xf32>
    %c0_3 = arith.constant 0 : index
    %c0_4 = arith.constant 0 : index
    %4 = vector.load %arg5[%c0_3, %c0_4] : memref<1x512xf32, #tpu.memory_space<vmem>>, vector<1x512xf32>
    %5 = vector.broadcast %4 : vector<1x512xf32> to vector<8x512xf32>
    %6 = arith.addf %3, %5 : vector<8x512xf32>
    %cst_5 = arith.constant 0.000000e+00 : f32
    %7 = vector.broadcast %cst_5 : f32 to vector<8x512xf32>
    %8 = arith.maximumf %6, %7 : vector<8x512xf32>
    %9 = arith.truncf %8 : vector<8x512xf32> to vector<8x512xbf16>
    %c0_6 = arith.constant 0 : index
    %c0_7 = arith.constant 0 : index
    %10 = vector.load %arg3[%c0_6, %c0_7] : memref<512x256xbf16, #tpu.memory_space<vmem>>, vector<512x256xbf16>
    %cst_8 = arith.constant dense<0.000000e+00> : vector<8x256xf32>
    %11 = tpu.matmul %9, %10, %cst_8 {dimension_numbers = #tpu.dot_dimension_numbers<[1], [0], [0], [1], [0, 0, 1, 1], [], []>} : vector<8x512xbf16>, vector<512x256xbf16>, vector<8x256xf32> -> vector<8x256xf32>
    %c0_9 = arith.constant 0 : index
    %c0_10 = arith.constant 0 : index
    %12 = vector.load %arg6[%c0_9, %c0_10] : memref<1x256xf32, #tpu.memory_space<vmem>>, vector<1x256xf32>
    %13 = vector.broadcast %12 : vector<1x256xf32> to vector<8x256xf32>
    %14 = arith.addf %11, %13 : vector<8x256xf32>
    %cst_11 = arith.constant 0.000000e+00 : f32
    %15 = vector.broadcast %cst_11 : f32 to vector<8x256xf32>
    %16 = arith.maximumf %14, %15 : vector<8x256xf32>
    %17 = arith.truncf %16 : vector<8x256xf32> to vector<8x256xbf16>
    %c0_12 = arith.constant 0 : index
    %c0_13 = arith.constant 0 : index
    %18 = vector.load %arg4[%c0_12, %c0_13] : memref<256x128xbf16, #tpu.memory_space<vmem>>, vector<256x128xbf16>
    %cst_14 = arith.constant dense<0.000000e+00> : vector<8x128xf32>
    %19 = tpu.matmul %17, %18, %cst_14 {dimension_numbers = #tpu.dot_dimension_numbers<[1], [0], [0], [1], [0, 0, 1, 1], [], []>} : vector<8x256xbf16>, vector<256x128xbf16>, vector<8x128xf32> -> vector<8x128xf32>
    %c0_15 = arith.constant 0 : index
    %c0_16 = arith.constant 0 : index
    %20 = vector.load %arg7[%c0_15, %c0_16] : memref<1x128xf32, #tpu.memory_space<vmem>>, vector<1x128xf32>
    %21 = vector.broadcast %20 : vector<1x128xf32> to vector<8x128xf32>
    %22 = arith.addf %19, %21 : vector<8x128xf32>
    %c0_17 = arith.constant 0 : index
    %c0_18 = arith.constant 0 : index
    %23 = vector.load %arg8[%c0_17, %c0_18] : memref<8x128xf32, #tpu.memory_space<vmem>>, vector<8x128xf32>
    tpu.vector_store %arg8[%c0_17, %c0_18], %22 {strides = array<i32>} : memref<8x128xf32, #tpu.memory_space<vmem>>, vector<8x128xf32>,
    return
  }
  func.func @transform_0(%arg0: i32) -> (i32, i32) {
    %c0_i32 = arith.constant 0 : i32
    %c0_i32_0 = arith.constant 0 : i32
    return %arg0, %c0_i32 : i32, i32
  }
  func.func @transform_1(%arg0: i32) -> (i32, i32) {
    %c0_i32 = arith.constant 0 : i32
    %c0_i32_0 = arith.constant 0 : i32
    %c0_i32_1 = arith.constant 0 : i32
    return %c0_i32, %c0_i32_0 : i32, i32
  }
  func.func @transform_2(%arg0: i32) -> (i32, i32) {
    %c0_i32 = arith.constant 0 : i32
    %c0_i32_0 = arith.constant 0 : i32
    %c0_i32_1 = arith.constant 0 : i32
    return %c0_i32, %c0_i32_0 : i32, i32
  }
  func.func @transform_3(%arg0: i32) -> (i32, i32) {
    %c0_i32 = arith.constant 0 : i32
    %c0_i32_0 = arith.constant 0 : i32
    %c0_i32_1 = arith.constant 0 : i32
    return %c0_i32, %c0_i32_0 : i32, i32
  }
  func.func @transform_4(%arg0: i32) -> (i32, i32) {
    %c0_i32 = arith.constant 0 : i32
    %c0_i32_0 = arith.constant 0 : i32
    %c0_i32_1 = arith.constant 0 : i32
    return %c0_i32, %c0_i32_0 : i32, i32
  }
  func.func @transform_5(%arg0: i32) -> (i32, i32) {
    %c0_i32 = arith.constant 0 : i32
    %c0_i32_0 = arith.constant 0 : i32
    %c0_i32_1 = arith.constant 0 : i32
    return %c0_i32, %c0_i32_0 : i32, i32
  }
  func.func @transform_6(%arg0: i32) -> (i32, i32) {
    %c0_i32 = arith.constant 0 : i32
    %c0_i32_0 = arith.constant 0 : i32
    %c0_i32_1 = arith.constant 0 : i32
    return %c0_i32, %c0_i32_0 : i32, i32
  }
  func.func @transform_7(%arg0: i32) -> (i32, i32) {
    %c0_i32 = arith.constant 0 : i32
    %c0_i32_0 = arith.constant 0 : i32
    return %arg0, %c0_i32 : i32, i32
  }
}

</mosaic_0001>

<bundles_post_ra>
// kernel: nest_mlp_forward.1
= control target key start
LH: loop header
LB: loop body
LE: loop exit
PB: predicated region body
PF: predicated region fallthrough
CT: control target
= control target key end

     0   :  { %12 = vsyncpa [#allocation3], 0  ;;  %s1574_s0 = inlined_call_operand.vmem [shape: f32[8,160], index: 0, kind: input, shape index: {}]   ;;  %s1575_s1 = inlined_call_operand.hbm [shape: bf16[160,512], index: 1, kind: input, shape index: {}]   ;;  %s1576_s2 = inlined_call_operand.hbm [shape: bf16[512,256], index: 2, kind: input, shape index: {}]   ;;  %s1577_s3 = inlined_call_operand.vmem [shape: bf16[256,128], index: 3, kind: input, shape index: {}]   ;;  %s1578_s4 = inlined_call_operand.vmem [shape: f32[1,512], index: 4, kind: input, shape index: {}]   ;;  %s1579_s5 = inlined_call_operand.vmem [shape: f32[1,256], index: 5, kind: input, shape index: {}]   ;;  %s1580_s6 = inlined_call_operand.vmem [shape: f32[1,128], index: 6, kind: input, shape index: {}]   ;;  %s1581_s7 = inlined_call_operand.vmem [shape: f32[8,128], index: 7, kind: output, shape index: {}]  }
   0x1   :  { %13 = vsyncpa [#allocation5], 0  ;;  %s1446_s24 = smov [#allocation2]  }
   0x2   :  { %s21_s25 = sshll.u32 %s1446_s24, 4  ;;  %s22_s25 = int_to_ptr.vmem [resolvable:$true] %s21_s25 }
   0x3   :  { %s1410_s26 = scalar_lea.vmem %s22_s25, 5120  ;;  %p1415_p1 = scmp.lt.s32.totalorder %s22_s25, %s22_s25 }
   0x4   :  { %p1411_p0 = scmp.ne.s32.totalorder %s22_s25, %s1410_s26  ;;  %p1416_p2 = scmp.lt.s32.totalorder %s1410_s26, %s1410_s26 }
   0x6   :  { %p1417_p3 = por %p1416_p2, %p1415_p1 }
   0x8   :  { %p1418_p4 = pnand %p1417_p3, %p1411_p0 }
   0xa   :  { %1421 = shalt.err (!%p1418_p4)
}
   0xb   :  { %s1447_s27 = smov 256   ;;  %s1448_s28 = smov 16  }
   0xc   :  { %27 = dma.hbm_to_vmem [thread:$0]  %s1575_s1, 5120, %s22_s25, [#allocation3], %s1447_s27, %s1447_s27, %s1448_s28  }
   0xd   :  { %s1449_s8 = smov [#allocation4]  }
   0xe   :  { %s33_s9 = sshll.u32 %s1449_s8, 4  ;;  %s34_s9 = int_to_ptr.vmem [resolvable:$true] %s33_s9 }
   0xf   :  { %s1430_s10 = scalar_lea.vmem %s34_s9, 8192  ;;  %p1435_p6 = scmp.lt.s32.totalorder %s34_s9, %s34_s9 }
  0x10   :  { %p1431_p5 = scmp.ne.s32.totalorder %s34_s9, %s1430_s10  ;;  %p1436_p7 = scmp.lt.s32.totalorder %s1430_s10, %s1430_s10 }
  0x12   :  { %p1437_p8 = por %p1436_p7, %p1435_p6 }
  0x14   :  { %p1438_p9 = pnand %p1437_p8, %p1431_p5 }
  0x16   :  { %1441 = shalt.err (!%p1438_p9)
}
  0x17   :  { %s1450_s11 = smov 128   ;;  %s1451_s12 = smov 8  }
  0x18   :  { %39 = dma.hbm_to_vmem [thread:$0]  %s1576_s2, 8192, %s34_s9, [#allocation5], %s1450_s11, %s1450_s11, %s1451_s12  }
  0x19   :  { %1442 = dma.done.wait [#allocation3], 5120  }
  0x1a   :  { %1443 = vsyncadd [#allocation3], 4294962176 }
  0x1b   :  { %1444 = dma.done.wait [#allocation5], 8192  }
  0x1c   :  { %1445 = vsyncadd [#allocation5], 4294959104  ;;  %v1230_v0 = vld [vmem:[#allocation2 + $0xe4] ss:$16 sps:$4 sm:$0xff]   ;;  %v1232_v1 = vld [vmem:[#allocation2 + $0xec] ss:$16 sps:$4 sm:$0xff]  }
  0x1d   :  { %325 = vmatprep.subr.bf16.mxu0 %v1230_v0  ;;  %v1234_v2 = vld [vmem:[#allocation2 + $0xe0] ss:$16 sps:$4 sm:$0xff]   ;;  %v1235_v3 = vld [vmem:[#allocation2 + $0xe8] ss:$16 sps:$4 sm:$0xff]   ;;  %366 = vmatprep.subr.bf16.mxu1 %v1232_v1  ;;  %v1236_v4 = vld [vmem:[#allocation2 + $0xc4] ss:$16 sps:$4 sm:$0xff]  }
  0x1e   :  { %326 = vmatpush1.bf16.msra.mxu0 %v1234_v2  ;;  %367 = vmatpush1.bf16.msra.mxu1 %v1235_v3  ;;  %v1238_v5 = vld [vmem:[#allocation2 + $0xcc] ss:$16 sps:$4 sm:$0xff]   ;;  %v1240_v6 = vld [vmem:[#allocation2 + $0xc0] ss:$16 sps:$4 sm:$0xff]   ;;  %v1241_v7 = vld [vmem:[#allocation2 + $0xc8] ss:$16 sps:$4 sm:$0xff]  }
  0x1f   :  { %327 = vmatprep.subr.bf16.mxu0 %v1236_v4  ;;  %368 = vmatprep.subr.bf16.mxu1 %v1238_v5  ;;  %v1242_v8 = vld [vmem:[#allocation2 + $0xa4] ss:$16 sps:$4 sm:$0xff]   ;;  %v1244_v9 = vld [vmem:[#allocation2 + $0xac] ss:$16 sps:$4 sm:$0xff]   ;;  %v1246_v10 = vld [vmem:[#allocation2 + $0xa0] ss:$16 sps:$4 sm:$0xff]  }
  0x20   :  { %v1247_v11 = vld [vmem:[#allocation2 + $0xa8] ss:$16 sps:$4 sm:$0xff]   ;;  %v1248_v12 = vld [vmem:[#allocation2 + $0x84] ss:$16 sps:$4 sm:$0xff]   ;;  %v1250_v13 = vld [vmem:[#allocation2 + $0x8c] ss:$16 sps:$4 sm:$0xff]  }
  0x21   :  { %v1252_v14 = vld [vmem:[#allocation2 + $0x80] ss:$16 sps:$4 sm:$0xff]   ;;  %v1253_v15 = vld [vmem:[#allocation2 + $0x88] ss:$16 sps:$4 sm:$0xff]   ;;  %v1254_v16 = vld [vmem:[#allocation2 + $0x64] ss:$16 sps:$4 sm:$0xff]  }
  0x22   :  { %328 = vmatpush1.bf16.msra.mxu0 %v1240_v6  ;;  %369 = vmatpush1.bf16.msra.mxu1 %v1241_v7  ;;  %v1256_v17 = vld [vmem:[#allocation2 + $0x6c] ss:$16 sps:$4 sm:$0xff]   ;;  %v1258_v18 = vld [vmem:[#allocation2 + $0x60] ss:$16 sps:$4 sm:$0xff]   ;;  %v1259_v19 = vld [vmem:[#allocation2 + $0x68] ss:$16 sps:$4 sm:$0xff]  }
  0x23   :  { %329 = vmatprep.subr.bf16.mxu0 %v1242_v8  ;;  %370 = vmatprep.subr.bf16.mxu1 %v1244_v9  ;;  %v1260_v20 = vld [vmem:[#allocation2 + $0x44] ss:$16 sps:$4 sm:$0xff]   ;;  %v1262_v21 = vld [vmem:[#allocation2 + $0x4c] ss:$16 sps:$4 sm:$0xff]   ;;  %v1264_v22 = vld [vmem:[#allocation2 + $0x40] ss:$16 sps:$4 sm:$0xff]  }
  0x24   :  { %v1265_v23 = vld [vmem:[#allocation2 + $0x48] ss:$16 sps:$4 sm:$0xff]   ;;  %v1266_v24 = vld [vmem:[#allocation2 + $0x24] ss:$16 sps:$4 sm:$0xff]   ;;  %v1268_v25 = vld [vmem:[#allocation2 + $0x2c] ss:$16 sps:$4 sm:$0xff]  }
  0x25   :  { %v1270_v26 = vld [vmem:[#allocation2 + $0x20] ss:$16 sps:$4 sm:$0xff]   ;;  %v1271_v27 = vld [vmem:[#allocation2 + $0x28] ss:$16 sps:$4 sm:$0xff]   ;;  %v1272_v28 = vld [vmem:[#allocation2 + $0x4] ss:$16 sps:$4 sm:$0xff]  }
  0x26   :  { %330 = vmatpush1.bf16.msra.mxu0 %v1246_v10  ;;  %371 = vmatpush1.bf16.msra.mxu1 %v1247_v11  ;;  %v1274_v29 = vld [vmem:[#allocation2 + $0xc] ss:$16 sps:$4 sm:$0xff]   ;;  %vm321_vm0 = vcmask 261120   ;;  %v1276_v32 = vld [vmem:[#allocation2] ss:$16 sps:$4 sm:$0xff]  }
  0x27   :  { %331 = vmatprep.subr.bf16.mxu0 %v1248_v12  ;;  %372 = vmatprep.subr.bf16.mxu1 %v1250_v13  ;;  %v56_v30 = vld [vmem:[%s1574_s0 + $0x8] sm:$0xff]  ;;  %v1278_v34 = vld [vmem:[#allocation2 + $0x124] ss:$16 sps:$4 sm:$0xff]   ;;  %v1282_v36 = vld [vmem:[#allocation2 + $0x120] ss:$16 sps:$4 sm:$0xff]  }
  0x28   :  { %v58_v31 = vpack.c.bf16 %v56_v30, %v56_v30  ;;  %v1277_v33 = vld [vmem:[#allocation2 + $0x8] ss:$16 sps:$4 sm:$0xff]   ;;  %v1280_v35 = vld [vmem:[#allocation2 + $0x12c] ss:$16 sps:$4 sm:$0xff]   ;;  %v1284_v38 = vld [vmem:[#allocation2 + $0x104] ss:$16 sps:$4 sm:$0xff]  }
  0x29   :  { %v1283_v37 = vld [vmem:[#allocation2 + $0x128] ss:$16 sps:$4 sm:$0xff]   ;;  %v1286_v39 = vld [vmem:[#allocation2 + $0x10c] ss:$16 sps:$4 sm:$0xff]   ;;  %v1288_v40 = vld [vmem:[#allocation2 + $0x100] ss:$16 sps:$4 sm:$0xff]  }
  0x2a   :  { %332 = vmatpush1.bf16.msra.mxu0 %v1252_v14  ;;  %373 = vmatpush1.bf16.msra.mxu1 %v1253_v15  ;;  %v1289_v41 = vld [vmem:[#allocation2 + $0x108] ss:$16 sps:$4 sm:$0xff]   ;;  %v55_v42 = vld [vmem:[%s1574_s0] sm:$0xff]  ;;  %v1292_v43 = vld [vmem:[#allocation4 + $0x74] ss:$8 sps:$4 sm:$0xff]  }
  0x2b   :  { %333 = vmatprep.subr.bf16.mxu0 %v1254_v16  ;;  %374 = vmatprep.subr.bf16.mxu1 %v1256_v17  ;;  %v1295_v44 = vld [vmem:[#allocation4 + $0x174] ss:$8 sps:$4 sm:$0xff]   ;;  %v57_v45 = vpack.c.bf16 %v55_v42, %v55_v42  ;;  %v1290_v46 = vld [vmem:[#allocation4 + $0x70] ss:$8 sps:$4 sm:$0xff]   ;;  %v1298_v48 = vld [vmem:[#allocation4 + $0x64] ss:$8 sps:$4 sm:$0xff]  }
  0x2c   :  { %1119 = vmatprep.mubr.msk.bf16.mxu0 %vm321_vm0, %v58_v31  ;;  %1120 = vmatprep.mubr.msk.bf16.mxu1 %vm321_vm0, %v58_v31  ;;  %v1293_v47 = vld [vmem:[#allocation4 + $0x170] ss:$8 sps:$4 sm:$0xff]   ;;  %v1301_v49 = vld [vmem:[#allocation4 + $0x164] ss:$8 sps:$4 sm:$0xff]   ;;  %v1296_v50 = vld [vmem:[#allocation4 + $0x60] ss:$8 sps:$4 sm:$0xff]  }
  0x2d   :  { %v1299_v51 = vld [vmem:[#allocation4 + $0x160] ss:$8 sps:$4 sm:$0xff]   ;;  %v1304_v52 = vld [vmem:[#allocation4 + $0x54] ss:$8 sps:$4 sm:$0xff]   ;;  %v1302_v54 = vld [vmem:[#allocation4 + $0x50] ss:$8 sps:$4 sm:$0xff]  }
  0x2e   :  { %334 = vmatpush1.bf16.msra.mxu0 %v1258_v18  ;;  %375 = vmatpush1.bf16.msra.mxu1 %v1259_v19  ;;  %v1307_v53 = vld [vmem:[#allocation4 + $0x154] ss:$8 sps:$4 sm:$0xff]   ;;  %v1305_v55 = vld [vmem:[#allocation4 + $0x150] ss:$8 sps:$4 sm:$0xff]   ;;  %v1310_v56 = vld [vmem:[#allocation4 + $0x44] ss:$8 sps:$4 sm:$0xff]  }
  0x2f   :  { %335 = vmatprep.subr.bf16.mxu0 %v1260_v20  ;;  %376 = vmatprep.subr.bf16.mxu1 %v1262_v21  ;;  %v1313_v57 = vld [vmem:[#allocation4 + $0x144] ss:$8 sps:$4 sm:$0xff]   ;;  %v1308_v58 = vld [vmem:[#allocation4 + $0x40] ss:$8 sps:$4 sm:$0xff]   ;;  %v1316_v60 = vld [vmem:[#allocation4 + $0x34] ss:$8 sps:$4 sm:$0xff]  }
  0x30   :  { %v1311_v59 = vld [vmem:[#allocation4 + $0x140] ss:$8 sps:$4 sm:$0xff]   ;;  %v1319_v61 = vld [vmem:[#allocation4 + $0x134] ss:$8 sps:$4 sm:$0xff]   ;;  %v1314_v62 = vld [vmem:[#allocation4 + $0x30] ss:$8 sps:$4 sm:$0xff]  }
  0x31   :  { %v1317_v63 = vld [vmem:[#allocation4 + $0x130] ss:$8 sps:$4 sm:$0xff]   ;;  %v1322_v0 = vld [vmem:[#allocation4 + $0x24] ss:$8 sps:$4 sm:$0xff]   ;;  %v1320_v2 = vld [vmem:[#allocation4 + $0x20] ss:$8 sps:$4 sm:$0xff]  }
  0x32   :  { %336 = vmatpush1.bf16.msra.mxu0 %v1264_v22  ;;  %377 = vmatpush1.bf16.msra.mxu1 %v1265_v23  ;;  %v1325_v1 = vld [vmem:[#allocation4 + $0x124] ss:$8 sps:$4 sm:$0xff]   ;;  %v1323_v3 = vld [vmem:[#allocation4 + $0x120] ss:$8 sps:$4 sm:$0xff]   ;;  %v1328_v4 = vld [vmem:[#allocation4 + $0x14] ss:$8 sps:$4 sm:$0xff]  }
  0x33   :  { %337 = vmatprep.subr.bf16.mxu0 %v1266_v24  ;;  %378 = vmatprep.subr.bf16.mxu1 %v1268_v25  ;;  %v1331_v5 = vld [vmem:[#allocation4 + $0x114] ss:$8 sps:$4 sm:$0xff]   ;;  %v1326_v6 = vld [vmem:[#allocation4 + $0x10] ss:$8 sps:$4 sm:$0xff]   ;;  %v1334_v8 = vld [vmem:[#allocation4 + $0x4] ss:$8 sps:$4 sm:$0xff]  }
  0x34   :  { %v1329_v7 = vld [vmem:[#allocation4 + $0x110] ss:$8 sps:$4 sm:$0xff]   ;;  %v1337_v9 = vld [vmem:[#allocation4 + $0x104] ss:$8 sps:$4 sm:$0xff]   ;;  %v1332_v10 = vld [vmem:[#allocation4] ss:$8 sps:$4 sm:$0xff]  }
  0x35   :  { %v1335_v11 = vld [vmem:[#allocation4 + $0x100] ss:$8 sps:$4 sm:$0xff]   ;;  %v1340_v12 = vld [vmem:[#allocation4 + $0xf4] ss:$8 sps:$4 sm:$0xff]   ;;  %v1338_v14 = vld [vmem:[#allocation4 + $0xf0] ss:$8 sps:$4 sm:$0xff]  }
  0x36   :  { %338 = vmatpush1.bf16.msra.mxu0 %v1270_v26  ;;  %379 = vmatpush1.bf16.msra.mxu1 %v1271_v27  ;;  %v1343_v13 = vld [vmem:[#allocation4 + $0x1f4] ss:$8 sps:$4 sm:$0xff]   ;;  %v1341_v15 = vld [vmem:[#allocation4 + $0x1f0] ss:$8 sps:$4 sm:$0xff]   ;;  %v1346_v16 = vld [vmem:[#allocation4 + $0xe4] ss:$8 sps:$4 sm:$0xff]  }
  0x37   :  { %339 = vmatprep.subr.bf16.mxu0 %v1272_v28  ;;  %380 = vmatprep.subr.bf16.mxu1 %v1274_v29  ;;  %v1349_v17 = vld [vmem:[#allocation4 + $0x1e4] ss:$8 sps:$4 sm:$0xff]   ;;  %v1344_v18 = vld [vmem:[#allocation4 + $0xe0] ss:$8 sps:$4 sm:$0xff]   ;;  %v1352_v20 = vld [vmem:[#allocation4 + $0xd4] ss:$8 sps:$4 sm:$0xff]  }
  0x38   :  { %v1347_v19 = vld [vmem:[#allocation4 + $0x1e0] ss:$8 sps:$4 sm:$0xff]   ;;  %v1355_v21 = vld [vmem:[#allocation4 + $0x1d4] ss:$8 sps:$4 sm:$0xff]   ;;  %v1350_v22 = vld [vmem:[#allocation4 + $0xd0] ss:$8 sps:$4 sm:$0xff]  }
  0x39   :  { %v1353_v23 = vld [vmem:[#allocation4 + $0x1d0] ss:$8 sps:$4 sm:$0xff]   ;;  %v1358_v24 = vld [vmem:[#allocation4 + $0xc4] ss:$8 sps:$4 sm:$0xff]   ;;  %v1356_v26 = vld [vmem:[#allocation4 + $0xc0] ss:$8 sps:$4 sm:$0xff]  }
  0x3a   :  { %340 = vmatpush1.bf16.msra.mxu0 %v1276_v32  ;;  %381 = vmatpush1.bf16.msra.mxu1 %v1277_v33  ;;  %v1361_v25 = vld [vmem:[#allocation4 + $0x1c4] ss:$8 sps:$4 sm:$0xff]   ;;  %v1359_v27 = vld [vmem:[#allocation4 + $0x1c0] ss:$8 sps:$4 sm:$0xff]   ;;  %v1364_v28 = vld [vmem:[#allocation4 + $0xb4] ss:$8 sps:$4 sm:$0xff]  }
  0x3b   :  { %353 = vmatprep.subr.bf16.mxu0 %v1278_v34  ;;  %394 = vmatprep.subr.bf16.mxu1 %v1280_v35  ;;  %v1367_v29 = vld [vmem:[#allocation4 + $0x1b4] ss:$8 sps:$4 sm:$0xff]   ;;  %v1362_v30 = vld [vmem:[#allocation4 + $0xb0] ss:$8 sps:$4 sm:$0xff]   ;;  %v1370_v32 = vld [vmem:[#allocation4 + $0xa4] ss:$8 sps:$4 sm:$0xff]  }
  0x3c   :  { %v1365_v31 = vld [vmem:[#allocation4 + $0x1b0] ss:$8 sps:$4 sm:$0xff]   ;;  %v1373_v33 = vld [vmem:[#allocation4 + $0x1a4] ss:$8 sps:$4 sm:$0xff]   ;;  %v1368_v34 = vld [vmem:[#allocation4 + $0xa0] ss:$8 sps:$4 sm:$0xff]  }
  0x3d   :  { %v1371_v35 = vld [vmem:[#allocation4 + $0x1a0] ss:$8 sps:$4 sm:$0xff]  }
  0x3e   :  { %354 = vmatpush2.bf16.msra.mxu0 %v1282_v36  ;;  %395 = vmatpush2.bf16.msra.mxu1 %v1283_v37  ;;  %v1376_v36 = vld [vmem:[#allocation4 + $0x94] ss:$8 sps:$4 sm:$0xff]   ;;  %v1380_v42 = vld [vmem:[#allocation4 + $0x80] ss:$8 sps:$4 sm:$0xff]  }
  0x3f   :  { %355 = vmatprep.subr.bf16.mxu0 %v1284_v38  ;;  %396 = vmatprep.subr.bf16.mxu1 %v1286_v39  ;;  %v1379_v37 = vld [vmem:[#allocation4 + $0x194] ss:$8 sps:$4 sm:$0xff]   ;;  %v1374_v38 = vld [vmem:[#allocation4 + $0x90] ss:$8 sps:$4 sm:$0xff]  }
  0x40   :  { %v1377_v39 = vld [vmem:[#allocation4 + $0x190] ss:$8 sps:$4 sm:$0xff]  }
  0x42   :  { %356 = vmatpush2.bf16.msra.mxu0 %v1288_v40  ;;  %397 = vmatpush2.bf16.msra.mxu1 %v1289_v41  ;;  %v1382_v40 = vld [vmem:[#allocation4 + $0x84] ss:$8 sps:$4 sm:$0xff]  }
  0x43   :  { %811 = vmatprep.subr.bf16.mxu0 %v1292_v43  ;;  %852 = vmatprep.subr.bf16.mxu1 %v1295_v44  ;;  %v1385_v41 = vld [vmem:[#allocation4 + $0x184] ss:$8 sps:$4 sm:$0xff]   ;;  %v1383_v43 = vld [vmem:[#allocation4 + $0x180] ss:$8 sps:$4 sm:$0xff]   ;;  %v1386_v44 = vld [vmem:[%s1577_s3 + $0x78] sm:$0xff]  }
  0x45   :  { %358 = vmatmul.mubr.bf16.vlgmr.msra.gmra.mxu0 %v57_v45  ;;  %399 = vmatmul.mubr.bf16.vlgmr.msra.gmra.mxu1 %v57_v45  ;;  %v101_v45 = vlaneseq }
  0x46   :  { %812 = vmatpush1.bf16.msra.mxu0 %v1290_v46  ;;  %853 = vmatpush1.bf16.msra.mxu1 %v1293_v47 }
  0x47   :  { %813 = vmatprep.subr.bf16.mxu0 %v1298_v48  ;;  %854 = vmatprep.subr.bf16.mxu1 %v1301_v49  ;;  %v1507_v46 = vshrl.u32 %v101_v45, 7  ;;  %v99_v49 = vld [vmem:[%s1578_s4] sm:$0xf] }
  0x49   :  { %v103_v47 = vsub.s32 0, %v1507_v46  ;;  %v111_v48 = vsub.s32 2, %v1507_v46 }
  0x4a   :  { %814 = vmatpush1.bf16.msra.mxu0 %v1296_v50  ;;  %855 = vmatpush1.bf16.msra.mxu1 %v1299_v51  ;;  %v107_v50 = vsub.s32 1, %v1507_v46  ;;  %v115_v51 = vsub.s32 3, %v1507_v46 }
  0x4b   :  { %815 = vmatprep.subr.bf16.mxu0 %v1304_v52  ;;  %856 = vmatprep.subr.bf16.mxu1 %v1307_v53  ;;  %v104_v52 = vrot.slane %v99_v49, %v103_v47  ;;  %v112_v53 = vrot.slane %v99_v49, %v111_v48 }
  0x4e   :  { %816 = vmatpush1.bf16.msra.mxu0 %v1302_v54  ;;  %857 = vmatpush1.bf16.msra.mxu1 %v1305_v55  ;;  %v108_v54 = vrot.slane %v99_v49, %v107_v50  ;;  %v116_v55 = vrot.slane %v99_v49, %v115_v51 }
  0x4f   :  { %817 = vmatprep.subr.bf16.mxu0 %v1310_v56  ;;  %858 = vmatprep.subr.bf16.mxu1 %v1313_v57 }
  0x52   :  { %818 = vmatpush1.bf16.msra.mxu0 %v1308_v58  ;;  %859 = vmatpush1.bf16.msra.mxu1 %v1311_v59 }
  0x53   :  { %819 = vmatprep.subr.bf16.mxu0 %v1316_v60  ;;  %860 = vmatprep.subr.bf16.mxu1 %v1319_v61 }
  0x56   :  { %820 = vmatpush1.bf16.msra.mxu0 %v1314_v62  ;;  %861 = vmatpush1.bf16.msra.mxu1 %v1317_v63 }
  0x57   :  { %821 = vmatprep.subr.bf16.mxu0 %v1322_v0  ;;  %862 = vmatprep.subr.bf16.mxu1 %v1325_v1 }
  0x5a   :  { %822 = vmatpush1.bf16.msra.mxu0 %v1320_v2  ;;  %863 = vmatpush1.bf16.msra.mxu1 %v1323_v3 }
  0x5b   :  { %823 = vmatprep.subr.bf16.mxu0 %v1328_v4  ;;  %864 = vmatprep.subr.bf16.mxu1 %v1331_v5 }
  0x5e   :  { %824 = vmatpush1.bf16.msra.mxu0 %v1326_v6  ;;  %865 = vmatpush1.bf16.msra.mxu1 %v1329_v7 }
  0x5f   :  { %825 = vmatprep.subr.bf16.mxu0 %v1334_v8  ;;  %866 = vmatprep.subr.bf16.mxu1 %v1337_v9 }
  0x62   :  { %826 = vmatpush1.bf16.msra.mxu0 %v1332_v10  ;;  %867 = vmatpush1.bf16.msra.mxu1 %v1335_v11  ;;  %v1387_v11 = vld [vmem:[%s1577_s3 + $0x38] sm:$0xff]  }
  0x63   :  { %827 = vmatprep.subr.bf16.mxu0 %v1340_v12  ;;  %868 = vmatprep.subr.bf16.mxu1 %v1343_v13  ;;  %v1388_v13 = vld [vmem:[%s1577_s3 + $0x70] sm:$0xff]  }
  0x66   :  { %828 = vmatpush2.bf16.msra.mxu0 %v1338_v14  ;;  %869 = vmatpush2.bf16.msra.mxu1 %v1341_v15  ;;  %v1389_v14 = vld [vmem:[%s1577_s3 + $0x30] sm:$0xff]   ;;  %v1390_v15 = vld [vmem:[%s1577_s3 + $0x68] sm:$0xff]  }
  0x67   :  { %829 = vmatprep.subr.bf16.mxu0 %v1346_v16  ;;  %870 = vmatprep.subr.bf16.mxu1 %v1349_v17  ;;  %v1391_v16 = vld [vmem:[%s1577_s3 + $0x28] sm:$0xff]   ;;  %v1392_v17 = vld [vmem:[%s1577_s3 + $0x60] sm:$0xff]  }
  0x6a   :  { %830 = vmatpush2.bf16.msra.mxu0 %v1344_v18  ;;  %871 = vmatpush2.bf16.msra.mxu1 %v1347_v19  ;;  %v1393_v18 = vld [vmem:[%s1577_s3 + $0x20] sm:$0xff]   ;;  %v1394_v19 = vld [vmem:[%s1577_s3 + $0x58] sm:$0xff]  }
  0x6b   :  { %831 = vmatprep.subr.bf16.mxu0 %v1352_v20  ;;  %872 = vmatprep.subr.bf16.mxu1 %v1355_v21  ;;  %v1395_v20 = vld [vmem:[%s1577_s3 + $0x18] sm:$0xff]   ;;  %v1396_v21 = vld [vmem:[%s1577_s3 + $0x50] sm:$0xff]  }
  0x6e   :  { %832 = vmatpush2.bf16.msra.mxu0 %v1350_v22  ;;  %873 = vmatpush2.bf16.msra.mxu1 %v1353_v23  ;;  %v1397_v22 = vld [vmem:[%s1577_s3 + $0x10] sm:$0xff]   ;;  %v1398_v23 = vld [vmem:[%s1577_s3 + $0x48] sm:$0xff]  }
  0x6f   :  { %833 = vmatprep.subr.bf16.mxu0 %v1358_v24  ;;  %874 = vmatprep.subr.bf16.mxu1 %v1361_v25  ;;  %v1399_v24 = vld [vmem:[%s1577_s3 + $0x8] sm:$0xff]   ;;  %v1400_v25 = vld [vmem:[%s1577_s3 + $0x40] sm:$0xff]  }
  0x72   :  { %834 = vmatpush2.bf16.msra.mxu0 %v1356_v26  ;;  %875 = vmatpush2.bf16.msra.mxu1 %v1359_v27  ;;  %v1401_v26 = vld [vmem:[%s1577_s3] sm:$0xff]  }
  0x73   :  { %835 = vmatprep.subr.bf16.mxu0 %v1364_v28  ;;  %876 = vmatprep.subr.bf16.mxu1 %v1367_v29  ;;  %v479_v27 = vld [vmem:[%s1579_s5] sm:$0x3] }
  0x74   :  { %v484_v28 = vrot.slane %v479_v27, %v103_v47  ;;  %v488_v29 = vrot.slane %v479_v27, %v107_v50  ;;  %v1185_v47 = vld [vmem:[%s1580_s6] ss:$0 sm:$0xff] }
  0x76   :  { %836 = vmatpush2.bf16.msra.mxu0 %v1362_v30  ;;  %877 = vmatpush2.bf16.msra.mxu1 %v1365_v31 }
  0x77   :  { %837 = vmatprep.subr.bf16.mxu0 %v1370_v32  ;;  %878 = vmatprep.subr.bf16.mxu1 %v1373_v33 }
  0x7a   :  { %838 = vmatpush2.bf16.msra.mxu0 %v1368_v34  ;;  %879 = vmatpush2.bf16.msra.mxu1 %v1371_v35 }
  0x7b   :  { %839 = vmatprep.subr.bf16.mxu0 %v1376_v36  ;;  %880 = vmatprep.subr.bf16.mxu1 %v1379_v37 }
  0x7e   :  { %840 = vmatpush2.bf16.msra.mxu0 %v1374_v38  ;;  %881 = vmatpush2.bf16.msra.mxu1 %v1377_v39 }
  0x7f   :  { %841 = vmatprep.subr.bf16.mxu0 %v1382_v40  ;;  %882 = vmatprep.subr.bf16.mxu1 %v1385_v41 }
  0x82   :  { %842 = vmatpush2.bf16.msra.mxu0 %v1380_v42  ;;  %883 = vmatpush2.bf16.msra.mxu1 %v1383_v43 }
  0x83   :  { %1202 = vmatprep.subr.bf16.mxu0 %v1386_v44 }
 0x105   :  { %v359_v56 = vpop.f32.mrf.mxu0  ;;  %v400_v57 = vpop.f32.mrf.mxu1 }
 0x106   :  { %v360_v58 = vadd.f32 %v359_v56, %v104_v52  ;;  %v401_v59 = vadd.f32 %v400_v57, %v112_v53 }
 0x107   :  { %v361_v60 = vpop.f32.mrf.mxu0  ;;  %v402_v61 = vpop.f32.mrf.mxu1 }
 0x108   :  { %v409_v62 = vmax.f32 %v401_v59, 0.0  ;;  %v362_v63 = vadd.f32 %v361_v60, %v108_v54  ;;  %v403_v0 = vadd.f32 %v402_v61, %v116_v55  ;;  %v407_v1 = vmax.f32 %v360_v58, 0.0 }
 0x109   :  { %v363_v2 = vpop.f32.mrf.mxu0  ;;  %v404_v3 = vpop.f32.mrf.mxu1 }
 0x10a   :  { %v408_v4 = vmax.f32 %v362_v63, 0.0  ;;  %v410_v5 = vmax.f32 %v403_v0, 0.0  ;;  %v413_v6 = vpack.c.bf16 %v409_v62, %v409_v62  ;;  %v411_v12 = vpack.c.bf16 %v407_v1, %v407_v1 }
 0x10b   :  { %v364_v7 = vpop.f32.mrf.mxu0  ;;  %v405_v8 = vpop.f32.mrf.mxu1 }
 0x10c   :  { %v412_v9 = vpack.c.bf16 %v408_v4, %v408_v4  ;;  %v414_v10 = vpack.c.bf16 %v410_v5, %v410_v5 }
 0x10e   :  { %843 = vmatprep.mubr.bf16.mxu0 %v412_v9  ;;  %884 = vmatprep.mubr.bf16.mxu1 %v414_v10 }
 0x10f   :  { %844 = vmatmul.mubr.bf16.vlgmr.msra.gmra.mxu0 %v411_v12  ;;  %885 = vmatmul.mubr.bf16.vlgmr.msra.gmra.mxu1 %v413_v6 }
 0x110   :  { %1203 = vmatpush3.bf16.msra.mxu0 %v1387_v11 }
 0x111   :  { %1204 = vmatprep.subr.bf16.mxu0 %v1388_v13 }
 0x114   :  { %1205 = vmatpush3.bf16.msra.mxu0 %v1389_v14 }
 0x115   :  { %1206 = vmatprep.subr.bf16.mxu0 %v1390_v15 }
 0x118   :  { %1207 = vmatpush3.bf16.msra.mxu0 %v1391_v16 }
 0x119   :  { %1208 = vmatprep.subr.bf16.mxu0 %v1392_v17 }
 0x11c   :  { %1209 = vmatpush3.bf16.msra.mxu0 %v1393_v18 }
 0x11d   :  { %1210 = vmatprep.subr.bf16.mxu0 %v1394_v19 }
 0x120   :  { %1211 = vmatpush3.bf16.msra.mxu0 %v1395_v20 }
 0x121   :  { %1212 = vmatprep.subr.bf16.mxu0 %v1396_v21 }
 0x124   :  { %1213 = vmatpush3.bf16.msra.mxu0 %v1397_v22 }
 0x125   :  { %1214 = vmatprep.subr.bf16.mxu0 %v1398_v23 }
 0x128   :  { %1215 = vmatpush3.bf16.msra.mxu0 %v1399_v24 }
 0x129   :  { %1216 = vmatprep.subr.bf16.mxu0 %v1400_v25 }
 0x12c   :  { %1217 = vmatpush3.bf16.msra.mxu0 %v1401_v26 }
 0x1cf   :  { %v845_v30 = vpop.f32.mrf.mxu0  ;;  %v886_v31 = vpop.f32.mrf.mxu1 }
 0x1d0   :  { %v846_v32 = vadd.f32 %v845_v30, %v484_v28 }
 0x1d1   :  { %v847_v33 = vpop.f32.mrf.mxu0  ;;  %v888_v34 = vpop.f32.mrf.mxu1 }
 0x1d2   :  { %v887_v35 = vadd.f32 %v886_v31, %v846_v32  ;;  %v848_v36 = vadd.f32 %v847_v33, %v488_v29 }
 0x1d3   :  { %v849_v37 = vpop.f32.mrf.mxu0  ;;  %v890_v38 = vpop.f32.mrf.mxu1 }
 0x1d4   :  { %v889_v39 = vadd.f32 %v888_v34, %v848_v36  ;;  %v893_v40 = vmax.f32 %v887_v35, 0.0 }
 0x1d5   :  { %v850_v41 = vpop.f32.mrf.mxu0  ;;  %v891_v42 = vpop.f32.mrf.mxu1 }
 0x1d6   :  { %v894_v43 = vmax.f32 %v889_v39, 0.0  ;;  %v895_v45 = vpack.c.bf16 %v893_v40, %v893_v40 }
 0x1d8   :  { %v896_v44 = vpack.c.bf16 %v894_v43, %v894_v43 }
 0x1da   :  { %1064 = vmatprep.mubr.bf16.mxu0 %v896_v44 }
 0x1db   :  { %1065 = vmatmul.mubr.bf16.vlgmr.msra.gmra.mxu0 %v895_v45 }
 0x29b   :  { %v1218_v46 = vpop.f32.mrf.mxu0 }
 0x29d   :  { %v1219_v48 = vpop.f32.mrf.mxu0 }
 0x29e   :  { %v1220_v49 = vadd.f32 %v1219_v48, %v1218_v46 }
 0x29f   :  { %v1221_v50 = vpop.f32.mrf.mxu0 }
 0x2a0   :  { %v1067_v51 = vadd.f32 %v1220_v49, %v1185_v47 }
 0x2a1   :  { %v1222_v52 = vpop.f32.mrf.mxu0 }
 0x2a2   :  { %1072 = vst [vmem:[%s1581_s7] sm:$0xff] %v1067_v51 }
 0x2a3   :  { %1077 = vsyncpa [#allocation3], 1 }
 0x2a4   :  { %1078 = vsyncpa [#allocation5], 1 }

</bundles_post_ra>
